<compile_context>
chip_gen: v5e
topology: v5e:2x2
jax: 0.10.0
libtpu: 0.0.40
codegen_flags: <defaults>
</compile_context>

<pallas_src>
import jax
import jax.numpy as jnp
from jax.experimental import pallas as pl
from jax.experimental.pallas import tpu as pltpu


def _vae_loss_kernel(scal_ref, x_ref, t_ref, mean_ref, logvar_ref, out_ref):
    """One (TB, D) batch tile per step; accumulate into the per-core out block."""
    step = pl.program_id(1)

    @pl.when(step == 0)
    def _init():
        out_ref[...] = jnp.zeros_like(out_ref)

    x = x_ref[...].astype(jnp.float32)
    t = t_ref[...].astype(jnp.float32)

    # binary_cross_entropy(reduction='none') with PyTorch's log clamp at -100.
    log_x = jnp.maximum(jnp.log(x), -100.0)
    log_1mx = jnp.maximum(jnp.log(1.0 - x), -100.0)
    bce = t * (log_1mx - log_x) - log_1mx           # == -(t*log_x + (1-t)*log_1mx)

    m = mean_ref[...].astype(jnp.float32)
    lv = logvar_ref[...].astype(jnp.float32)
    kld_terms = jnp.exp(lv) + m * m - 1.0 - lv

    half_beta = scal_ref[0, 0]                      # 0.5 * beta (SMEM scalar)
    tile_sum = jnp.sum(bce) + half_beta * jnp.sum(kld_terms)

    # Broadcast-add the scalar into the resident (1, 8, 128) accumulator block
    # (a single vreg): every element of slab c ends up holding core c's total.
    out_ref[...] = out_ref[...] + tile_sum


def _choose_tile_rows(batch, feat):
    """~1 MiB per f32 input block, multiple of 8 sublanes, capped at 1024."""
    cap = ((1 << 18) // max(feat, 1)) // 8 * 8      # (2^20 bytes) / (4 * feat)
    cap = max(8, min(cap, 1024))
    rows_needed = ((batch + 7) // 8) * 8
    return min(cap, rows_needed)


def vae_loss(inp, target, mean, logvar, *, beta=1.0, tile_rows=None):
    """Scalar VAE loss. inp/target: (B, D); mean/logvar: (B, Z)."""
    B, D = inp.shape
    Bm, Z = mean.shape
    assert Bm == B and target.shape == inp.shape and logvar.shape == mean.shape

    inp = inp.astype(jnp.float32)
    target = target.astype(jnp.float32)
    mean = mean.astype(jnp.float32)
    logvar = logvar.astype(jnp.float32)

    if tile_rows is None:
        TB = _choose_tile_rows(B, D)
    else:
        TB = max(8, (int(tile_rows) // 8) * 8)

    n_tiles = -(-B // TB)
    NC = 2 if n_tiles >= 2 else 1                   # split batch across 2 TCs (v7x)
    NT = -(-n_tiles // NC)
    B_pad = NC * NT * TB

    if B_pad != B:
        pad = B_pad - B                             # zero rows contribute 0 loss
        inp = jnp.pad(inp, ((0, pad), (0, 0)))
        target = jnp.pad(target, ((0, pad), (0, 0)))
        mean = jnp.pad(mean, ((0, pad), (0, 0)))
        logvar = jnp.pad(logvar, ((0, pad), (0, 0)))

    # SMEM scalar: 0.5 * beta (dynamic -> no recompile across beta values).
    scal = jnp.reshape(jnp.asarray(beta, dtype=jnp.float32) * 0.5, (1, 1))

    batch_map = lambda c, t: (c * NT + t, 0)

    out = pl.pallas_call(
        _vae_loss_kernel,
        out_shape=jax.ShapeDtypeStruct((NC, 8, 128), jnp.float32),
        grid=(NC, NT),
        in_specs=[
            pl.BlockSpec(memory_space=pltpu.SMEM),   # (1,1) [0.5*beta]
            pl.BlockSpec((TB, D), batch_map),        # input
            pl.BlockSpec((TB, D), batch_map),        # target
            pl.BlockSpec((TB, Z), batch_map),        # mean
            pl.BlockSpec((TB, Z), batch_map),        # logvar
        ],
        out_specs=pl.BlockSpec((1, 8, 128), lambda c, t: (c, 0, 0)),
        compiler_params=pltpu.CompilerParams(
            dimension_semantics=("parallel", "arbitrary")),
    )(scal, inp, target, mean, logvar)

    # Each (8,128) slab is uniformly filled with that core's partial sum of
    # (sum_bce + 0.5*beta*sum_kld); combine cores and normalize by the TRUE B.
    return jnp.sum(out[:, 0, 0]) / B


def vae_loss_ref(inp, target, mean, logvar, *, beta=1.0):
    """Pure-JAX reference mirroring the PyTorch module."""
    log_x = jnp.maximum(jnp.log(inp), -100.0)
    log_1mx = jnp.maximum(jnp.log(1.0 - inp), -100.0)
    bce = -(target * log_x + (1.0 - target) * log_1mx)
    recon = jnp.mean(jnp.sum(bce, axis=1))
    kld = beta * 0.5 * jnp.mean(
        jnp.sum(jnp.exp(logvar) + jnp.square(mean) - 1.0 - logvar, axis=1)
    )
    return recon + kld


def _make_inputs(key, B, D, Z):
    k1, k2, k3, k4 = jax.random.split(key, 4)
    inp = jax.nn.sigmoid(jax.random.normal(k1, (B, D), dtype=jnp.float32))
    target = jax.random.uniform(k2, (B, D), dtype=jnp.float32)
    mean = jax.random.normal(k3, (B, Z), dtype=jnp.float32) * 0.5
    logvar = jax.random.normal(k4, (B, Z), dtype=jnp.float32) * 0.1
    return inp, target, mean, logvar


if __name__ == "__main__":
    key = jax.random.PRNGKey(0)
    k_a, k_b, k_c = jax.random.split(key, 3)

    # 1) basic shape (single tile)
    inp, tgt, mu, lv = _make_inputs(k_a, 8, 256, 32)
    loss = vae_loss(inp, tgt, mu, lv, beta=1.0)
    jax.block_until_ready(loss)
    ref = vae_loss_ref(inp, tgt, mu, lv, beta=1.0)
    assert jnp.allclose(loss, ref, rtol=1e-4, atol=1e-4), (loss, ref)

    # 2) ragged batch (zero-padding path) + non-default beta
    inp, tgt, mu, lv = _make_inputs(k_b, 13, 256, 32)
    loss = vae_loss(inp, tgt, mu, lv, beta=0.5)
    jax.block_until_ready(loss)
    ref = vae_loss_ref(inp, tgt, mu, lv, beta=0.5)
    assert jnp.allclose(loss, ref, rtol=1e-4, atol=1e-4), (loss, ref)

    # 3) multi-tile + 2-core split + ragged pad (small tile_rows to force a grid)
    inp, tgt, mu, lv = _make_inputs(k_c, 40, 256, 32)
    loss = vae_loss(inp, tgt, mu, lv, beta=2.0, tile_rows=8)
    jax.block_until_ready(loss)
    ref = vae_loss_ref(inp, tgt, mu, lv, beta=2.0)
    assert jnp.allclose(loss, ref, rtol=1e-4, atol=1e-4), (loss, ref)

    print("KERNEL_OK")
</pallas_src>

<mosaic_0001>
module attributes {stable_mosaic.version = 11 : i64} {
  func.func @_vae_loss_kernel(%arg0: i32, %arg1: i32, %arg2: memref<1x1xf32, #tpu.memory_space<smem>>, %arg3: memref<8x256xf32, #tpu.memory_space<vmem>>, %arg4: memref<8x256xf32, #tpu.memory_space<vmem>>, %arg5: memref<8x32xf32, #tpu.memory_space<vmem>>, %arg6: memref<8x32xf32, #tpu.memory_space<vmem>>, %arg7: memref<1x8x128xf32, #tpu.memory_space<vmem>>) attributes {dimension_semantics = [#tpu.dimension_semantics<parallel>, #tpu.dimension_semantics<arbitrary>], iteration_bounds = array<i64: 1, 1>, scalar_prefetch = 0 : i64, scratch_operands = 0 : i64, tpu.core_type = #tpu.core_type<tc>, window_params = [{transform_indices = @transform_0, window_bounds = array<i64: 1, 1>}, {transform_indices = @transform_1, window_bounds = array<i64: 8, 256>}, {transform_indices = @transform_2, window_bounds = array<i64: 8, 256>}, {transform_indices = @transform_3, window_bounds = array<i64: 8, 32>}, {transform_indices = @transform_4, window_bounds = array<i64: 8, 32>}, {transform_indices = @transform_5, window_bounds = array<i64: 1, 8, 128>}]} {
    %c0_i32 = arith.constant 0 : i32
    %0 = arith.cmpi eq, %arg1, %c0_i32 : i32
    %1 = arith.extui %0 : i1 to i32
    %c0_i32_0 = arith.constant 0 : i32
    %2 = arith.cmpi ne, %1, %c0_i32_0 : i32
    scf.if %2 {
      %cst_21 = arith.constant 0.000000e+00 : f32
      %39 = vector.broadcast %cst_21 : f32 to vector<1x8x128xf32>
      %c0_22 = arith.constant 0 : index
      %c0_23 = arith.constant 0 : index
      %c0_24 = arith.constant 0 : index
      %40 = vector.load %arg7[%c0_22, %c0_23, %c0_24] : memref<1x8x128xf32, #tpu.memory_space<vmem>>, vector<1x8x128xf32>
      tpu.vector_store %arg7[%c0_22, %c0_23, %c0_24], %39 {strides = array<i32>} : memref<1x8x128xf32, #tpu.memory_space<vmem>>, vector<1x8x128xf32>,
    } else {
    }
    %c0 = arith.constant 0 : index
    %c0_1 = arith.constant 0 : index
    %3 = vector.load %arg3[%c0, %c0_1] : memref<8x256xf32, #tpu.memory_space<vmem>>, vector<8x256xf32>
    %c0_2 = arith.constant 0 : index
    %c0_3 = arith.constant 0 : index
    %4 = vector.load %arg4[%c0_2, %c0_3] : memref<8x256xf32, #tpu.memory_space<vmem>>, vector<8x256xf32>
    %5 = math.log %3 : vector<8x256xf32>
    %cst = arith.constant -1.000000e+02 : f32
    %6 = vector.broadcast %cst : f32 to vector<8x256xf32>
    %7 = arith.maximumf %5, %6 : vector<8x256xf32>
    %cst_4 = arith.constant 1.000000e+00 : f32
    %8 = vector.broadcast %cst_4 : f32 to vector<8x256xf32>
    %9 = arith.subf %8, %3 : vector<8x256xf32>
    %10 = math.log %9 : vector<8x256xf32>
    %cst_5 = arith.constant -1.000000e+02 : f32
    %11 = vector.broadcast %cst_5 : f32 to vector<8x256xf32>
    %12 = arith.maximumf %10, %11 : vector<8x256xf32>
    %13 = arith.subf %12, %7 : vector<8x256xf32>
    %14 = arith.mulf %4, %13 : vector<8x256xf32>
    %15 = arith.subf %14, %12 : vector<8x256xf32>
    %c0_6 = arith.constant 0 : index
    %c0_7 = arith.constant 0 : index
    %16 = vector.load %arg5[%c0_6, %c0_7] : memref<8x32xf32, #tpu.memory_space<vmem>>, vector<8x32xf32>
    %c0_8 = arith.constant 0 : index
    %c0_9 = arith.constant 0 : index
    %17 = vector.load %arg6[%c0_8, %c0_9] : memref<8x32xf32, #tpu.memory_space<vmem>>, vector<8x32xf32>
    %18 = math.exp %17 : vector<8x32xf32>
    %19 = arith.mulf %16, %16 : vector<8x32xf32>
    %20 = arith.addf %18, %19 : vector<8x32xf32>
    %cst_10 = arith.constant 1.000000e+00 : f32
    %21 = vector.broadcast %cst_10 : f32 to vector<8x32xf32>
    %22 = arith.subf %20, %21 : vector<8x32xf32>
    %23 = arith.subf %22, %17 : vector<8x32xf32>
    %c0_11 = arith.constant 0 : index
    %c0_12 = arith.constant 0 : index
    %24 = memref.load %arg2[%c0_11, %c0_12] : memref<1x1xf32, #tpu.memory_space<smem>>
    %25 = vector.shape_cast %15 : vector<8x256xf32> to vector<1x8x256xf32>
    %cst_13 = arith.constant dense<0.000000e+00> : vector<1xf32>
    %26 = vector.multi_reduction <add>, %25, %cst_13 [1, 2] : vector<1x8x256xf32> to vector<1xf32>
    %27 = vector.shape_cast %26 : vector<1xf32> to vector<1x1x1xf32>
    %28 = vector.extract %27[0, 0, 0] : f32 from vector<1x1x1xf32>
    %29 = vector.shape_cast %23 : vector<8x32xf32> to vector<1x8x32xf32>
    %cst_14 = arith.constant dense<0.000000e+00> : vector<1xf32>
    %30 = vector.multi_reduction <add>, %29, %cst_14 [1, 2] : vector<1x8x32xf32> to vector<1xf32>
    %31 = vector.shape_cast %30 : vector<1xf32> to vector<1x1x1xf32>
    %32 = vector.extract %31[0, 0, 0] : f32 from vector<1x1x1xf32>
    %33 = arith.mulf %24, %32 : f32
    %34 = arith.addf %28, %33 : f32
    %c0_15 = arith.constant 0 : index
    %c0_16 = arith.constant 0 : index
    %c0_17 = arith.constant 0 : index
    %35 = vector.load %arg7[%c0_15, %c0_16, %c0_17] : memref<1x8x128xf32, #tpu.memory_space<vmem>>, vector<1x8x128xf32>
    %36 = vector.broadcast %34 : f32 to vector<1x8x128xf32>
    %37 = arith.addf %35, %36 : vector<1x8x128xf32>
    %c0_18 = arith.constant 0 : index
    %c0_19 = arith.constant 0 : index
    %c0_20 = arith.constant 0 : index
    %38 = vector.load %arg7[%c0_18, %c0_19, %c0_20] : memref<1x8x128xf32, #tpu.memory_space<vmem>>, vector<1x8x128xf32>
    tpu.vector_store %arg7[%c0_18, %c0_19, %c0_20], %37 {strides = array<i32>} : memref<1x8x128xf32, #tpu.memory_space<vmem>>, vector<1x8x128xf32>,
    return
  }
  func.func @transform_0(%arg0: i32, %arg1: i32) -> (i32, i32) {
    %c0_i32 = arith.constant 0 : i32
    %c0_i32_0 = arith.constant 0 : i32
    %c0_i32_1 = arith.constant 0 : i32
    return %c0_i32, %c0_i32_0 : i32, i32
  }
  func.func @transform_1(%arg0: i32, %arg1: i32) -> (i32, i32) {
    %c1_i32 = arith.constant 1 : i32
    %0 = arith.muli %arg0, %c1_i32 : i32
    %1 = arith.addi %0, %arg1 : i32
    %c0_i32 = arith.constant 0 : i32
    %c0_i32_0 = arith.constant 0 : i32
    return %1, %c0_i32 : i32, i32
  }
  func.func @transform_2(%arg0: i32, %arg1: i32) -> (i32, i32) {
    %c1_i32 = arith.constant 1 : i32
    %0 = arith.muli %arg0, %c1_i32 : i32
    %1 = arith.addi %0, %arg1 : i32
    %c0_i32 = arith.constant 0 : i32
    %c0_i32_0 = arith.constant 0 : i32
    return %1, %c0_i32 : i32, i32
  }
  func.func @transform_3(%arg0: i32, %arg1: i32) -> (i32, i32) {
    %c1_i32 = arith.constant 1 : i32
    %0 = arith.muli %arg0, %c1_i32 : i32
    %1 = arith.addi %0, %arg1 : i32
    %c0_i32 = arith.constant 0 : i32
    %c0_i32_0 = arith.constant 0 : i32
    return %1, %c0_i32 : i32, i32
  }
  func.func @transform_4(%arg0: i32, %arg1: i32) -> (i32, i32) {
    %c1_i32 = arith.constant 1 : i32
    %0 = arith.muli %arg0, %c1_i32 : i32
    %1 = arith.addi %0, %arg1 : i32
    %c0_i32 = arith.constant 0 : i32
    %c0_i32_0 = arith.constant 0 : i32
    return %1, %c0_i32 : i32, i32
  }
  func.func @transform_5(%arg0: i32, %arg1: i32) -> (i32, i32, i32) {
    %c0_i32 = arith.constant 0 : i32
    %c0_i32_0 = arith.constant 0 : i32
    %c0_i32_1 = arith.constant 0 : i32
    return %arg0, %c0_i32, %c0_i32_0 : i32, i32, i32
  }
}

</mosaic_0001>

<bundles_post_ra>
// kernel: tpu_custom_call.1
= control target key start
LH: loop header
LB: loop body
LE: loop exit
PB: predicated region body
PF: predicated region fallthrough
CT: control target
= control target key end

     0   :  { %11 = vsyncpa [#allocation4], 0  ;;  %s381_s0 = inlined_call_operand.<no memory space> [shape: f32[1,1], index: 0, kind: input, shape index: {}]   ;;  %s382_s1 = inlined_call_operand.hbm [shape: f32[8,256], index: 1, kind: input, shape index: {}]   ;;  %s383_s2 = inlined_call_operand.hbm [shape: f32[8,256], index: 2, kind: input, shape index: {}]   ;;  %s384_s3 = inlined_call_operand.hbm [shape: f32[8,32], index: 3, kind: input, shape index: {}]   ;;  %s385_s4 = inlined_call_operand.hbm [shape: f32[8,32], index: 4, kind: input, shape index: {}]   ;;  %s386_s5 = inlined_call_operand.hbm [shape: f32[1,8,128], index: 5, kind: output, shape index: {}]  }
   0x1   :  { %12 = vsyncpa [#allocation7], 0 }
   0x2   :  { %13 = vsyncpa [#allocation10], 0  ;;  %s41_s20 = sshll.u32 %s383_s2, 4  ;;  %s42_s20 = int_to_ptr.hbm [resolvable:$true] %s41_s20 }
   0x3   :  { %14 = vsyncpa [#allocation5], 0  ;;  %s328_s21 = smov [#allocation6]   ;;  %s26_s25 = sshll.u32 %s382_s1, 4  ;;  %s27_s25 = int_to_ptr.hbm [resolvable:$true] %s26_s25 }
   0x4   :  { %s43_s22 = sshll.u32 %s328_s21, 4  ;;  %s329_s26 = smov [#allocation3]   ;;  %s44_s22 = int_to_ptr.vmem [resolvable:$true] %s43_s22 }
   0x5   :  { %46 = dma.hbm_to_vmem [thread:$0]  %s42_s20, 256, %s44_s22, [#allocation7]  }
   0x6   :  { %s28_s27 = sshll.u32 %s329_s26, 4  ;;  %s55_s30 = sshll.u32 %s384_s3, 4  ;;  %s29_s27 = int_to_ptr.vmem [resolvable:$true] %s28_s27  ;;  %s56_s30 = int_to_ptr.hbm [resolvable:$true] %s55_s30 }
   0x7   :  { %31 = dma.hbm_to_vmem [thread:$0]  %s27_s25, 256, %s29_s27, [#allocation4]  }
   0x8   :  { %s69_s7 = sshll.u32 %s385_s4, 4  ;;  %s330_s8 = smov [#allocation8]   ;;  %s70_s7 = int_to_ptr.hbm [resolvable:$true] %s69_s7 }
   0x9   :  { %s57_s9 = sshll.u32 %s330_s8, 4  ;;  %s331_s1 = smov [#allocation9]   ;;  %s58_s9 = int_to_ptr.vmem [resolvable:$true] %s57_s9 }
   0xa   :  { %60 = dma.hbm_to_vmem [thread:$0]  %s56_s30, 128, %s58_s9, [#allocation7]  }
   0xb   :  { %s71_s10 = sshll.u32 %s331_s1, 4  ;;  %s72_s10 = int_to_ptr.vmem [resolvable:$true] %s71_s10 }
   0xc   :  { %74 = dma.hbm_to_vmem [thread:$0]  %s70_s7, 128, %s72_s10, [#allocation10]  }
   0xd   :  { %320 = dma.done.wait [#allocation4], 256  }
   0xe   :  { %321 = vsyncadd [#allocation4], 4294967040 }
   0xf   :  { %322 = dma.done.wait [#allocation7], 384  }
  0x10   :  { %323 = vsyncadd [#allocation7], 4294966912 }
  0x11   :  { %324 = dma.done.wait [#allocation10], 128  }
  0x12   :  { %325 = vsyncadd [#allocation10], 4294967168  ;;  %v100_v0 = vld [vmem:[#allocation3] sm:$0xff]  ;;  %v101_v1 = vld [vmem:[#allocation3 + $0x8] sm:$0xff]  ;;  %vm143_vm0 = vcmask 261120   ;;  %s332_s14 = smov [#allocation11]  }
  0x13   :  { %190 = vlog2.f32 %v100_v0  ;;  %v110_v2 = vsub.f32 1.0, %v100_v0  ;;  %v111_v3 = vsub.f32 1.0, %v101_v1  ;;  %v125_v4 = vld [vmem:[#allocation9] sm:$0xff]  ;;  %v124_v11 = vld [vmem:[#allocation8] sm:$0xff]  ;;  %v102_v20 = vld [vmem:[#allocation6] sm:$0xff]  ;;  %s165_s15 = sshll.u32 %s332_s14, 4  ;;  %s166_s15 = int_to_ptr.vmem [resolvable:$true] %s165_s15 }
  0x14   :  { %192 = vlog2.f32 %v101_v1  ;;  %v126_v5 = vmul.f32 1.442695, %v125_v4  ;;  %v128_v18 = vmul.f32 %v124_v11, %v124_v11  ;;  %v103_v22 = vld [vmem:[#allocation6 + $0x8] sm:$0xff]  ;;  %s167_s19 = sshll.u32 %s386_s5, 4  ;;  %s168_s19 = int_to_ptr.hbm [resolvable:$true] %s167_s19 }
  0x15   :  { %194 = vlog2.f32 %v110_v2 }
  0x16   :  { %196 = vlog2.f32 %v111_v3 }
  0x17   :  { %198 = vpow2.f32 %v126_v5 }
  0x19   :  { %v191_v6 = vpop.eup %190 }
  0x1a   :  { %v193_v7 = vpop.eup %192  ;;  %v105_v8 = vmul.f32 0.6931472, %v191_v6 }
  0x1b   :  { %v195_v9 = vpop.eup %194  ;;  %v107_v10 = vmul.f32 0.6931472, %v193_v7 }
  0x1c   :  { %v197_v12 = vpop.eup %196  ;;  %v108_v13 = vmax.f32 %v105_v8, -100.0  ;;  %v113_v14 = vmul.f32 0.6931472, %v195_v9 }
  0x1d   :  { %v109_v15 = vmax.f32 %v107_v10, -100.0  ;;  %v115_v16 = vmul.f32 0.6931472, %v197_v12  ;;  %v199_v19 = vpop.eup %198 }
  0x1e   :  { %v116_v17 = vmax.f32 %v113_v14, -100.0  ;;  %v129_v26 = vadd.f32 %v199_v19, %v128_v18 }
  0x1f   :  { %v117_v21 = vmax.f32 %v115_v16, -100.0 }
  0x20   :  { %v118_v23 = vsub.f32 %v116_v17, %v108_v13  ;;  %v179_v30 = vadd.f32 -1.0, %v129_v26 }
  0x21   :  { %v119_v24 = vsub.f32 %v117_v21, %v109_v15 }
  0x22   :  { %v120_v25 = vmul.f32 %v118_v23, %v102_v20  ;;  %v131_v32 = vsub.f32 %v179_v30, %v125_v4 }
  0x23   :  { %v121_v27 = vmul.f32 %v119_v24, %v103_v22 }
  0x24   :  { %v122_v28 = vsub.f32 %v120_v25, %v116_v17  ;;  %v144_v33 = vsel %vm143_vm0, %v131_v32, 0.0 }
  0x25   :  { %v123_v29 = vsub.f32 %v121_v27, %v117_v21 }
  0x27   :  { %v133_v31 = vadd.f32 %v123_v29, %v122_v28 }
  0x29   :  { %134 = vadd.xlane.f32.xlu0 %v133_v31 }
  0x31   :  { %145 = vadd.xlane.f32.xlu0 %v144_v33 }
  0x9c   :  { %v135_v34 = vpop.xlane.xlu0 %134 }
  0x9d   :  { %v136_v35 = vrot.slane %v135_v34, 4 }
  0x9f   :  { %v137_v36 = vadd.f32 %v136_v35, %v135_v34 }
  0xa1   :  { %v138_v37 = vrot.slane %v137_v36, 2 }
  0xa3   :  { %v139_v38 = vadd.f32 %v138_v37, %v137_v36 }
  0xa4   :  { %v146_v39 = vpop.xlane.xlu0 %145 }
  0xa5   :  { %v147_v40 = vrot.slane %v146_v39, 4  ;;  %v140_v41 = vrot.slane %v139_v38, 1 }
  0xa7   :  { %v148_v42 = vadd.f32 %v147_v40, %v146_v39  ;;  %v141_v43 = vadd.f32 %v140_v41, %v139_v38 }
  0xa9   :  { %v149_v44 = vrot.slane %v148_v42, 2  ;;  %180 = vpush %v141_v43 }
  0xab   :  { %v150_v45 = vadd.f32 %v149_v44, %v148_v42 }
  0xad   :  { %v151_v46 = vrot.slane %v150_v45, 1 }
  0xaf   :  { %v152_v47 = vadd.f32 %v151_v46, %v150_v45 }
  0xb1   :  { %182 = vpush %v152_v47 }
  0xda   :  { %s181_s3 = spop %180 }
  0xe2   :  { %s183_s4 = spop %182 }
  0xe3   :  { %s154_s13 = smul.f32 %s183_s4, %s381_s0 }
  0xe5   :  { %s155_s16 = sadd.f32 %s181_s3, %s154_s13 }
  0xe7   :  { %v157_v48 = vstv %s155_s16 }
  0xe8   :  { %159 = vst [vmem:[#allocation11] sm:$0xff] %v157_v48 }
  0xe9   :  { %170 = dma.vmem_to_hbm [thread:$0]  %s166_s15, 128, %s168_s19, [#allocation5]  }
  0xea   :  { %326 = dma.done.wait [#allocation5], 128  }
  0xeb   :  { %327 = vsyncadd [#allocation5], 4294967168 }
  0xec   :  { %175 = vsyncpa [#allocation4], 1 }
  0xed   :  { %176 = vsyncpa [#allocation7], 1 }
  0xee   :  { %177 = vsyncpa [#allocation10], 1 }
  0xef   :  { %178 = vsyncpa [#allocation5], 1 }

</bundles_post_ra>
